<compile_context>
chip_gen: v7x
topology: tpu7x:2x2x1
jax: 0.10.0
libtpu: 0.0.40
codegen_flags: <defaults>
</compile_context>

<pallas_src>
import jax
import jax.numpy as jnp
from jax.experimental import pallas as pl
from jax.experimental.pallas import tpu as pltpu

LANE = 128                            # channel padding (MXU / vreg lane width)
TILE = 512                            # node tile for big graphs (TM = TK = 512)
ADJ_QMAX = 127.0                      # int8 adjacency quantization scale
H1_RESIDENT_BYTES = 8 * 1024 * 1024   # keep h1 fully VMEM-resident below this
VMEM_LIMIT = 32 * 1024 * 1024         # safe on v5e/v6e (128 MiB) and v7x (64 MiB)


def _round_up(x, m):
  return (x + m - 1) // m * m


def _choose_tiling(n):
  """Node padding and (TM, TK) tiles.

  Big graphs: 512x512 adjacency tiles. Small graphs: one k step (no
  accumulator / k loop) and n_i == 2 so the 'parallel' axis still shards
  across both v7x TensorCores (harmless on single-TC v5e/v6e).
  """
  np0 = _round_up(max(n, 1), 256)
  if np0 >= 2 * TILE:
    np_ = _round_up(n, TILE)
    return np_, TILE, TILE
  return np0, np0 // 2, np0


# ---------------------------------------------------------------------------
# Pallas kernels
# ---------------------------------------------------------------------------
def _conv1x1_bn_relu_kernel(x_ref, w_ref, b_ref, o_ref):
  """Conv1x1BnRelu on a tile of nodes (BN folded into w/b); bf16 output."""
  h = jnp.dot(x_ref[...].astype(jnp.bfloat16), w_ref[...],
              preferred_element_type=jnp.float32)
  o_ref[...] = jnp.maximum(h + b_ref[...], 0.0).astype(o_ref.dtype)


def _make_resblock_kernel(has_skip, multi_k, h1_resident, tk):
  """Fused GraphConvBnRelu + Conv1x1Bn + skip + ReLU for one GraphResBlock."""

  def kernel(h1_ref, xi_ref, adj_ref, w2_ref, b2_ref, w3_ref, b3_ref, *rest):
    if has_skip:
      wsk_ref, bsk_ref = rest[0], rest[1]
      rest = rest[2:]
    out_ref = rest[0]
    acc_ref = rest[1] if multi_k else None

    # h1 slice for this adjacency K tile (h1 was computed once by the
    # conv1x1a kernel; when resident it is DMA'd into VMEM a single time).
    if multi_k and h1_resident:
      k = pl.program_id(1)
      row0 = pl.multiple_of(k * tk, tk)
      h1_blk = h1_ref[pl.ds(row0, tk), :]
    else:
      h1_blk = h1_ref[...]

    # Graph aggregation on the int8 adjacency tile; the 1/ADJ_QMAX dequant
    # scale is folded into w2, so the raw integer codes are used directly.
    # TODO(synk): HGraph class not provided; its sparse neighbor gather at
    # `depth` is modeled as a dense row-normalized adjacency matmul.
    adj_b = adj_ref[...].astype(jnp.float32).astype(jnp.bfloat16)
    partial = jnp.dot(adj_b, h1_blk, preferred_element_type=jnp.float32)

    def finalize(agg):
      # GraphConvBnRelu channel mix (+ folded BN) + ReLU.
      h2 = jnp.dot(agg.astype(jnp.bfloat16), w2_ref[...],
                   preferred_element_type=jnp.float32)
      h2 = jnp.maximum(h2 + b2_ref[...], 0.0)
      # Conv1x1Bn.
      h3 = jnp.dot(h2.astype(jnp.bfloat16), w3_ref[...],
                   preferred_element_type=jnp.float32) + b3_ref[...]
      # Skip: conv1x1c only when in_channels != out_channels (PyTorch `if`),
      # otherwise the raw input added in f32.
      if has_skip:
        skip = jnp.dot(xi_ref[...].astype(jnp.bfloat16), wsk_ref[...],
                       preferred_element_type=jnp.float32) + bsk_ref[...]
      else:
        skip = xi_ref[...].astype(jnp.float32)
      out_ref[...] = jnp.maximum(h3 + skip, 0.0).astype(out_ref.dtype)

    if multi_k:
      k = pl.program_id(1)

      @pl.when(k == 0)
      def _():
        acc_ref[...] = jnp.zeros_like(acc_ref)

      acc_ref[...] += partial

      @pl.when(k == pl.num_programs(1) - 1)
      def _():
        finalize(acc_ref[...])
    else:
      finalize(partial)

  return kernel


# ---------------------------------------------------------------------------
# Per-block wrapper
# ---------------------------------------------------------------------------
def graph_resblock_pallas(x_pad, adj_q, prep, tm, tk, out_dtype):
  """One GraphResBlock forward: conv1x1a kernel + fused aggregation kernel."""
  np_, cin_p = x_pad.shape
  cb_p = prep["w1"].shape[1]
  cout_p = prep["w3"].shape[1]
  has_skip = prep["has_skip"]
  assert np_ % tm == 0 and np_ % tk == 0
  n_i, n_k = np_ // tm, np_ // tk
  multi_k = n_k > 1
  h1_resident = np_ * cb_p * 2 <= H1_RESIDENT_BYTES

  # conv1x1a (+BN+ReLU) exactly once over all nodes -> bf16 h1.
  h1 = pl.pallas_call(
      _conv1x1_bn_relu_kernel,
      grid_spec=pltpu.PrefetchScalarGridSpec(
          num_scalar_prefetch=0,
          grid=(n_i,),
          in_specs=[pl.BlockSpec((tm, cin_p), lambda i: (i, 0)),
                    pl.BlockSpec(prep["w1"].shape, lambda i: (0, 0)),
                    pl.BlockSpec(prep["b1"].shape, lambda i: (0, 0))],
          out_specs=pl.BlockSpec((tm, cb_p), lambda i: (i, 0))),
      out_shape=jax.ShapeDtypeStruct((np_, cb_p), jnp.bfloat16),
      compiler_params=pltpu.CompilerParams(
          dimension_semantics=("parallel",),
          vmem_limit_bytes=VMEM_LIMIT),
  )(x_pad, prep["w1"], prep["b1"])

  if multi_k:
    h1_spec = (pl.BlockSpec((np_, cb_p), lambda i, k: (0, 0)) if h1_resident
               else pl.BlockSpec((tk, cb_p), lambda i, k: (k, 0)))
    xi_spec = pl.BlockSpec((tm, cin_p), lambda i, k: (i, 0))
    adj_spec = pl.BlockSpec((tm, tk), lambda i, k: (i, k))
    out_spec = pl.BlockSpec((tm, cout_p), lambda i, k: (i, 0))

    def const(shape):
      return pl.BlockSpec(shape, lambda i, k: (0, 0))

    grid = (n_i, n_k)
    semantics = ("parallel", "arbitrary")
    scratch = [pltpu.VMEM((tm, cb_p), jnp.float32)]
  else:
    # Small-graph fast path: single k step, no accumulator scratch.
    h1_spec = pl.BlockSpec((np_, cb_p), lambda i: (0, 0))
    xi_spec = pl.BlockSpec((tm, cin_p), lambda i: (i, 0))
    adj_spec = pl.BlockSpec((tm, tk), lambda i: (i, 0))
    out_spec = pl.BlockSpec((tm, cout_p), lambda i: (i, 0))

    def const(shape):
      return pl.BlockSpec(shape, lambda i: (0, 0))

    grid = (n_i,)
    semantics = ("parallel",)
    scratch = []

  in_specs = [h1_spec, xi_spec, adj_spec,
              const(prep["w2"].shape), const(prep["b2"].shape),
              const(prep["w3"].shape), const(prep["b3"].shape)]
  args = [h1, x_pad, adj_q,
          prep["w2"], prep["b2"], prep["w3"], prep["b3"]]
  if has_skip:
    in_specs += [const(prep["wsk"].shape), const(prep["bsk"].shape)]
    args += [prep["wsk"], prep["bsk"]]

  return pl.pallas_call(
      _make_resblock_kernel(has_skip, multi_k, h1_resident, tk),
      grid_spec=pltpu.PrefetchScalarGridSpec(
          num_scalar_prefetch=0,
          grid=grid,
          in_specs=in_specs,
          out_specs=out_spec,
          scratch_shapes=scratch),
      out_shape=jax.ShapeDtypeStruct((np_, cout_p), out_dtype),
      compiler_params=pltpu.CompilerParams(
          dimension_semantics=semantics,
          vmem_limit_bytes=VMEM_LIMIT),
  )(*args)


def graph_resblocks_forward(x, adj, blocks_prepped, out_channels):
  """GraphResBlocks.forward: pad + quantize once, chain fused blocks."""
  # TODO(synk): the adjacency is still re-streamed from HBM once per resblock;
  # fusing the whole chain into a single pallas_call (leading block grid axis,
  # uniformly padded / stacked weights) would remove (resblk_num-1)*N^2 bytes
  # of the dominant stream but needs cross-block write/read hazard handling.
  n, in_c = x.shape
  np_, tm, tk = _choose_tiling(n)
  cin_p = _round_up(in_c, LANE)
  h = jnp.pad(x, ((0, np_ - n), (0, cin_p - in_c)))
  # int8 adjacency (row-normalized values in [0,1]); the dequant scale is
  # folded into each block's w2 -> halves the dominant HBM stream.
  adj_p = jnp.pad(adj, ((0, np_ - n), (0, np_ - n)))
  adj_q = jnp.round(jnp.clip(adj_p, -1.0, 1.0) * ADJ_QMAX).astype(jnp.int8)
  last = len(blocks_prepped) - 1
  for bi, prep in enumerate(blocks_prepped):
    out_dtype = jnp.float32 if bi == last else jnp.bfloat16
    h = graph_resblock_pallas(h, adj_q, prep, tm, tk, out_dtype)
  return h[:n, :out_channels]


# ---------------------------------------------------------------------------
# Deterministic parameter construction (mirrors module __init__ shapes)
# ---------------------------------------------------------------------------
def _conv1x1_weight(key, cin, cout):
  # PyTorch Conv1d(cin, cout, 1, bias=False).weight is (cout, cin, 1);
  # stored here transposed as (cin, cout) for x @ W.
  return (jax.random.normal(key, (cin, cout), jnp.float32)
          / jnp.sqrt(jnp.float32(cin)))


def _bn_params(key, c):
  kg, kb, km, kv = jax.random.split(key, 4)
  return dict(
      gamma=1.0 + 0.1 * jax.random.normal(kg, (c,), jnp.float32),
      beta=0.1 * jax.random.normal(kb, (c,), jnp.float32),
      mean=0.1 * jax.random.normal(km, (c,), jnp.float32),
      var=1.0 + jnp.abs(jax.random.normal(kv, (c,), jnp.float32)))


def init_resblock_params(key, in_c, out_c, bottleneck=4):
  cb = out_c // bottleneck
  ks = jax.random.split(key, 8)
  p = dict(in_c=in_c, out_c=out_c, cb=cb,
           w1=_conv1x1_weight(ks[0], in_c, cb), bn1=_bn_params(ks[1], cb),
           w2=_conv1x1_weight(ks[2], cb, cb), bn2=_bn_params(ks[3], cb),
           w3=_conv1x1_weight(ks[4], cb, out_c), bn3=_bn_params(ks[5], out_c))
  if in_c != out_c:
    p["wsk"] = _conv1x1_weight(ks[6], in_c, out_c)
    p["bnsk"] = _bn_params(ks[7], out_c)
  return p


def _fold_bn(w, bn, eps=1e-5):
  # Inference-form BN folded into the conv weight + a per-channel shift.
  # TODO(synk): training-mode BatchNorm statistics are not modeled.
  scale = bn["gamma"] / jnp.sqrt(bn["var"] + eps)
  shift = bn["beta"] - bn["mean"] * scale
  return w * scale[None, :], shift[None, :]


def _pad2(a, rows, cols):
  return jnp.pad(a, ((0, rows - a.shape[0]), (0, cols - a.shape[1])))


def prepare_resblock(p):
  """Fold BN + adjacency-dequant scale into weights; pad to 128x; bf16."""
  cin_p = _round_up(p["in_c"], LANE)
  cb_p = _round_up(p["cb"], LANE)
  cout_p = _round_up(p["out_c"], LANE)
  w1, b1 = _fold_bn(p["w1"], p["bn1"])
  w2, b2 = _fold_bn(p["w2"], p["bn2"])
  w3, b3 = _fold_bn(p["w3"], p["bn3"])
  w2 = w2 / ADJ_QMAX   # int8-adjacency dequant folded into the conv weight
  prep = dict(
      has_skip=(p["in_c"] != p["out_c"]),
      w1=_pad2(w1, cin_p, cb_p).astype(jnp.bfloat16), b1=_pad2(b1, 1, cb_p),
      w2=_pad2(w2, cb_p, cb_p).astype(jnp.bfloat16), b2=_pad2(b2, 1, cb_p),
      w3=_pad2(w3, cb_p, cout_p).astype(jnp.bfloat16), b3=_pad2(b3, 1, cout_p))
  if prep["has_skip"]:
    wsk, bsk = _fold_bn(p["wsk"], p["bnsk"])
    prep["wsk"] = _pad2(wsk, cin_p, cout_p).astype(jnp.bfloat16)
    prep["bsk"] = _pad2(bsk, 1, cout_p)
  return prep


# ---------------------------------------------------------------------------
# Plain-JAX reference (same folded-BN / int8-adj / bf16-matmul math)
# ---------------------------------------------------------------------------
def _resblock_ref(h, adj_q, prep, out_dtype):
  hb = h.astype(jnp.bfloat16)
  h1 = jnp.maximum(
      jnp.dot(hb, prep["w1"], preferred_element_type=jnp.float32) + prep["b1"],
      0.0).astype(jnp.bfloat16)
  adj_b = adj_q.astype(jnp.float32).astype(jnp.bfloat16)
  agg = jnp.dot(adj_b, h1, preferred_element_type=jnp.float32)
  h2 = jnp.maximum(
      jnp.dot(agg.astype(jnp.bfloat16), prep["w2"],
              preferred_element_type=jnp.float32) + prep["b2"], 0.0)
  h3 = jnp.dot(h2.astype(jnp.bfloat16), prep["w3"],
               preferred_element_type=jnp.float32) + prep["b3"]
  if prep["has_skip"]:
    skip = jnp.dot(hb, prep["wsk"],
                   preferred_element_type=jnp.float32) + prep["bsk"]
  else:
    skip = h.astype(jnp.float32)
  return jnp.maximum(h3 + skip, 0.0).astype(out_dtype)


def _forward_ref(x, adj, blocks_prepped, out_channels):
  n, in_c = x.shape
  np_, _, _ = _choose_tiling(n)
  cin_p = _round_up(in_c, LANE)
  h = jnp.pad(x, ((0, np_ - n), (0, cin_p - in_c)))
  adj_p = jnp.pad(adj, ((0, np_ - n), (0, np_ - n)))
  adj_q = jnp.round(jnp.clip(adj_p, -1.0, 1.0) * ADJ_QMAX).astype(jnp.int8)
  last = len(blocks_prepped) - 1
  for bi, prep in enumerate(blocks_prepped):
    out_dtype = jnp.float32 if bi == last else jnp.bfloat16
    h = _resblock_ref(h, adj_q, prep, out_dtype)
  return h[:n, :out_channels]


# ---------------------------------------------------------------------------
if __name__ == "__main__":
  # Small, module-consistent shapes.
  N = 256           # graph nodes at hgraph depth `depth`
  IN_C = 64         # in_channels
  OUT_C = 128       # out_channels
  RESBLK_NUM = 2
  BOTTLENECK = 4    # -> channelb = 32

  root = jax.random.PRNGKey(0)
  kx, kp = jax.random.split(root)

  # Input node features (N, C_in).
  x = jax.random.normal(kx, (N, IN_C), jnp.float32)

  # Synthetic hgraph neighborhood at `depth`: ring + self loops, row-normalized
  # (guarded against zero-degree rows).
  idx = jnp.arange(N)
  adj = jnp.zeros((N, N), jnp.float32)
  adj = adj.at[idx, idx].set(1.0)
  adj = adj.at[idx, (idx + 1) % N].set(1.0)
  adj = adj.at[idx, (idx - 1) % N].set(1.0)
  adj = adj / jnp.maximum(adj.sum(axis=1, keepdims=True), 1.0)

  channels = [IN_C] + [OUT_C] * RESBLK_NUM
  keys = jax.random.split(kp, RESBLK_NUM)
  raw_params = [init_resblock_params(keys[i], channels[i], channels[i + 1],
                                     BOTTLENECK) for i in range(RESBLK_NUM)]
  blocks_prepped = [prepare_resblock(p) for p in raw_params]

  out = graph_resblocks_forward(x, adj, blocks_prepped, OUT_C)
  out = jax.block_until_ready(out)

  ref = jax.block_until_ready(_forward_ref(x, adj, blocks_prepped, OUT_C))
  assert out.shape == (N, OUT_C)
  assert jnp.allclose(out, ref, atol=1e-2, rtol=1e-2), \
      float(jnp.max(jnp.abs(out - ref)))

  print("KERNEL_OK")
</pallas_src>

<mosaic_0001>
module attributes {stable_mosaic.version = 11 : i64} {
  func.func @_conv1x1_bn_relu_kernel(%arg0: i32, %arg1: memref<128x128xf32, #tpu.memory_space<vmem>>, %arg2: memref<128x128xbf16, #tpu.memory_space<vmem>>, %arg3: memref<1x128xf32, #tpu.memory_space<vmem>>, %arg4: memref<128x128xbf16, #tpu.memory_space<vmem>>) attributes {dimension_semantics = [#tpu.dimension_semantics<parallel>], iteration_bounds = array<i64: 2>, scalar_prefetch = 0 : i64, scratch_operands = 0 : i64, tpu.core_type = #tpu.core_type<tc>, window_params = [{transform_indices = @transform_0, window_bounds = array<i64: 128, 128>}, {pipeline_mode = #tpu.pipeline_mode<synchronous>, transform_indices = @transform_1, window_bounds = array<i64: 128, 128>}, {pipeline_mode = #tpu.pipeline_mode<synchronous>, transform_indices = @transform_2, window_bounds = array<i64: 1, 128>}, {transform_indices = @transform_3, window_bounds = array<i64: 128, 128>}]} {
    %c0 = arith.constant 0 : index
    %c0_0 = arith.constant 0 : index
    %0 = vector.load %arg1[%c0, %c0_0] : memref<128x128xf32, #tpu.memory_space<vmem>>, vector<128x128xf32>
    %1 = arith.truncf %0 : vector<128x128xf32> to vector<128x128xbf16>
    %c0_1 = arith.constant 0 : index
    %c0_2 = arith.constant 0 : index
    %2 = vector.load %arg2[%c0_1, %c0_2] : memref<128x128xbf16, #tpu.memory_space<vmem>>, vector<128x128xbf16>
    %cst = arith.constant dense<0.000000e+00> : vector<128x128xf32>
    %3 = tpu.matmul %1, %2, %cst {dimension_numbers = #tpu.dot_dimension_numbers<[1], [0], [0], [1], [0, 0, 1, 1], [], []>} : vector<128x128xbf16>, vector<128x128xbf16>, vector<128x128xf32> -> vector<128x128xf32>
    %c0_3 = arith.constant 0 : index
    %c0_4 = arith.constant 0 : index
    %4 = vector.load %arg3[%c0_3, %c0_4] : memref<1x128xf32, #tpu.memory_space<vmem>>, vector<1x128xf32>
    %5 = vector.broadcast %4 : vector<1x128xf32> to vector<128x128xf32>
    %6 = arith.addf %3, %5 : vector<128x128xf32>
    %cst_5 = arith.constant 0.000000e+00 : f32
    %7 = vector.broadcast %cst_5 : f32 to vector<128x128xf32>
    %8 = arith.maximumf %6, %7 : vector<128x128xf32>
    %9 = arith.truncf %8 : vector<128x128xf32> to vector<128x128xbf16>
    %c0_6 = arith.constant 0 : index
    %c0_7 = arith.constant 0 : index
    %10 = vector.load %arg4[%c0_6, %c0_7] : memref<128x128xbf16, #tpu.memory_space<vmem>>, vector<128x128xbf16>
    tpu.vector_store %arg4[%c0_6, %c0_7], %9 {strides = array<i32>} : memref<128x128xbf16, #tpu.memory_space<vmem>>, vector<128x128xbf16>,
    return
  }
  func.func @transform_0(%arg0: i32) -> (i32, i32) {
    %c0_i32 = arith.constant 0 : i32
    %c0_i32_0 = arith.constant 0 : i32
    return %arg0, %c0_i32 : i32, i32
  }
  func.func @transform_1(%arg0: i32) -> (i32, i32) {
    %c0_i32 = arith.constant 0 : i32
    %c0_i32_0 = arith.constant 0 : i32
    %c0_i32_1 = arith.constant 0 : i32
    return %c0_i32, %c0_i32_0 : i32, i32
  }
  func.func @transform_2(%arg0: i32) -> (i32, i32) {
    %c0_i32 = arith.constant 0 : i32
    %c0_i32_0 = arith.constant 0 : i32
    %c0_i32_1 = arith.constant 0 : i32
    return %c0_i32, %c0_i32_0 : i32, i32
  }
  func.func @transform_3(%arg0: i32) -> (i32, i32) {
    %c0_i32 = arith.constant 0 : i32
    %c0_i32_0 = arith.constant 0 : i32
    return %arg0, %c0_i32 : i32, i32
  }
}

</mosaic_0001>

<bundles_post_ra>
// kernel: tpu_custom_call.1
= control target key start
LH: loop header
LB: loop body
LE: loop exit
PB: predicated region body
PF: predicated region fallthrough
CT: control target
= control target key end

     0   :  { %8 = vsyncpa [#allocation3], 0  ;;  %s1226_s0 = inlined_call_operand.hbm [shape: f32[256,128], index: 0, kind: input, shape index: {}]   ;;  %s1227_s1 = inlined_call_operand.hbm [shape: bf16[128,128], index: 1, kind: input, shape index: {}]   ;;  %s1228_s2 = inlined_call_operand.vmem [shape: f32[1,128], index: 2, kind: input, shape index: {}]   ;;  %s1229_s3 = inlined_call_operand.hbm [shape: bf16[256,128], index: 3, kind: output, shape index: {}]  }
   0x1   :  { %10 = vsyncpa [#allocation3 + $0x1], 0 }
   0x2   :  { %11 = vsyncpa [#allocation6], 0 }
   0x3   :  { %12 = vsyncpa [#allocation4], 0 }
   0x4   :  { %14 = vsyncpa [#allocation4 + $0x1], 0  ;;  %s992_s12 = smov 0   ;;  %s994_s13 = smov 0  }
   0x5   :  { %s996_s14 = smov 0   ;;  %s998_s15 = smov 0  }
   0x6 LB: > { %s1013_s16 = sadd.s32 4294967295, %s961_s15   ;;  %s592_s17 = sadd.s32 4294967294, %s961_s15   ;;  %s961_s15 = sphi %s998_s15, %s1249_s15   ;;  %s957_s14 = sphi %s996_s14, %s1248_s14   ;;  %s953_s13 = sphi %s994_s13, %s1247_s13   ;;  %s949_s12 = sphi %s992_s12, %s1246_s12  }
   0x7   : > { %p40_p0 = scmp.ne.s32.totalorder %s953_s13, %s949_s12  ;;  %p1230_p1 = scmp.eq.s32.totalorder %s1013_s16, 0 }
   0x8   : > { %p112_p3 = scmp.eq.s32.totalorder %s592_s17, 1  ;;  %p593_p5 = scmp.ge.s32.totalorder %s961_s15, 1 }
   0x9   : > { %p1022_p4 = por %p1230_p1, %p40_p0  ;;  %p119_p7 = scmp.lt.s32.totalorder %s961_s15, 3 }
   0xa   : > { %p1027_p6 = por %p112_p3, %p40_p0  ;;  %s963_s21 = smov [#allocation5]  }
   0xb   : > { %s1233_s18 = scalar_select %p1022_p4, 1, 0 }
   0xc   : > { %s1234_s19 = scalar_select %p1027_p6, 1, 0 }
   0xd   : > { %p1032_p8 = pnand %p593_p5, %p119_p7  ;;  %s131_s22 = sshll.u32 %s963_s21, 4  ;;  %s1036_s22 = int_to_ptr.vmem [resolvable:$true] %s131_s22 }
   0xe   : > { %s1048_s24 = sadd.s32 1, %s961_s15   ;;  %s27_s25 = sadd.s32 1, %s957_s14 }
   0xf   : > { %s1235_s20 = scalar_select %p1032_p8, 1, 0 }
  0x10   : > { %p770_p9 = pneg %p1032_p8  ;;  %s24_s26 = ssub.s32 %s961_s15, %s1048_s24 }
  0x11   : > { %s833_s29 = scalar_lea.hbm %s1227_s1, 1024 }
  0x12   : > { %p1043_p11 = pnand %p770_p9, %p1230_p1  ;;  %p834_p12 = scmp.ne.s32.totalorder %s1227_s1, %s833_s29 }
  0x13   : > { %p840_p5 = scmp.lt.u32.totalorder %s833_s29, %s1227_s1 }
  0x14   : > { %p835_p13 = pneg %p1043_p11 }
  0x16   : > { %p836_p0 = pnand %p835_p13, %p834_p12 }
  0x18   : > { %p837_p3 = pneg %p836_p0 }
  0x1a   : > { %p842_p7 = pnand %p840_p5, %p837_p3 }
  0x1c   : > { %845 = shalt.err (!%p842_p7)
}
  0x1d   : > { %s846_s7 = scalar_lea.vmem %s1036_s22, 1024  ;;  %p854_p2 = scmp.lt.s32.totalorder %s1036_s22, %s1036_s22 }
  0x1e   : > { %p847_p9 = scmp.ne.s32.totalorder %s1036_s22, %s846_s7  ;;  %p855_p6 = scmp.lt.s32.totalorder %s846_s7, %s846_s7 }
  0x20   : > { %p849_p10 = pnand %p847_p9, %p835_p13  ;;  %p856_p4 = por %p855_p6, %p854_p2 }
  0x22   : > { %p850_p1 = pneg %p849_p10 }
  0x24   : > { %p857_p8 = pnand %p856_p4, %p850_p1 }
  0x26   : > { %860 = shalt.err (!%p857_p8)
}
  0x27   : > { %s964_s8 = smov 64   ;;  %s965_s9 = smov 4  }
  0x28   : > { %773 = dma.hbm_to_vmem [thread:$0]  (!%p1043_p11), %s1227_s1, 1024, %s1036_s22, [#allocation6], %s964_s8, %s964_s8, %s965_s9  }
  0x29   : > { %p25_p2 = scmp.eq.s32.totalorder %s24_s26, 0  ;;  %p34_p1 = scmp.ne.s32.totalorder %s957_s14, %s953_s13 }
  0x2a   : > { %p35_p4 = scmp.eq.s32.totalorder %s961_s15, 0  ;;  %p783_p6 = scmp.lt.s32.totalorder %s961_s15, 2 }
  0x2b   : > { %s1079_s17 = scalar_select %p25_p2, %s957_s14, %s27_s25  }
  0x2c   : > { %p36_p8 = por %p35_p4, %p34_p1  ;;  %p1237_p10 = scmp.eq.s32.totalorder %s1013_s16, 1 }
  0x2d   : > { %s148_s27 = sand.u32 1, %s957_s14   ;;  %s633_s28 = sshll.u32 %s961_s15, 11 }
  0x2e   : > { %p1083_p12 = por %p1237_p10, %p34_p1  ;;  %s596_s29 = sshll.u32 %s148_s27, 7 }
  0x2f   : > { %s1092_s4 = scalar_lea.hbm %s1226_s0, %s633_s28  ;;  %s152_s22 = scalar_lea.vmem [#allocation2], %s596_s29 }
  0x30   : > { %s159_s25 = sshll.u32 %s152_s22, 4  ;;  %p1094_p11 = pnand %p783_p6, %p36_p8  ;;  %s1098_s25 = int_to_ptr.vmem [resolvable:$true] %s159_s25 }
  0x31   : > { %s1100_s5 = scalar_lea.sflag [#allocation3], %s148_s27  ;;  %s861_s6 = scalar_lea.hbm %s1092_s4, 2048 }
  0x32   : > { %p862_p13 = scmp.ne.s32.totalorder %s1092_s4, %s861_s6  ;;  %p863_p0 = pneg %p1094_p11 }
  0x33   : > { %s866_s9 = scalar_lea.hbm %s1226_s0, 4096  ;;  %p867_p7 = scmp.lt.u32.totalorder %s1092_s4, %s1226_s0 }
  0x34   : > { %p864_p3 = pnand %p863_p0, %p862_p13  ;;  %p868_p9 = scmp.lt.u32.totalorder %s866_s9, %s861_s6 }
  0x35   : > { %p870_p1 = scmp.lt.u32.totalorder %s861_s6, %s1092_s4 }
  0x36   : > { %p865_p5 = pneg %p864_p3  ;;  %p869_p2 = por %p868_p9, %p867_p7 }
  0x38   : > { %p871_p4 = por %p870_p1, %p869_p2 }
  0x3a   : > { %p872_p6 = pnand %p871_p4, %p865_p5 }
  0x3c   : > { %875 = shalt.err (!%p872_p6)
}
  0x3d   : > { %s876_s27 = scalar_lea.vmem %s1098_s25, 2048  ;;  %s966_s28 = smov [#allocation2]  }
  0x3e   : > { %p877_p8 = scmp.ne.s32.totalorder %s1098_s25, %s876_s27  ;;  %s881_s29 = sshll.u32 %s966_s28, 4  ;;  %s882_s29 = int_to_ptr.vmem [resolvable:$false] %s881_s29 }
  0x3f   : > { %s883_s23 = scalar_lea.vmem %s882_s29, 4096  ;;  %p884_p3 = scmp.lt.s32.totalorder %s1098_s25, %s882_s29 }
  0x40   : > { %p879_p10 = pnand %p877_p8, %p863_p0  ;;  %p885_p7 = scmp.lt.s32.totalorder %s883_s23, %s876_s27 }
  0x42   : > { %p880_p13 = pneg %p879_p10  ;;  %p886_p9 = por %p885_p7, %p884_p3 }
  0x44   : > { %p887_p2 = pnand %p886_p9, %p880_p13 }
  0x46   : > { %890 = shalt.err (!%p887_p2)
}
  0x47   : > { %s967_s30 = smov 128   ;;  %s968_s22 = smov 8  }
  0x48   : > { %777 = dma.hbm_to_vmem [thread:$0]  (!%p1094_p11), %s1092_s4, 2048, %s1098_s25, %s1100_s5, %s967_s30, %s967_s30, %s968_s22  }
  0x49   : > { %p1240_p0 = scmp.ne.s32.totalorder %s1235_s20, 0 }
  0x4a   : > { %s1131_s6 = sand.u32 (!%p1240_p0), 1, %s953_s13   ;;  %p1241_p5 = scmp.ne.s32.totalorder (!%p1240_p0), %s1233_s18, 0 }
  0x4b   : > { %171 = sbr.rel (%p1240_p0) target bundleno = 363 (0x16b), region = 32  ;;  %s600_s7 = sshll.u32 (!%p1240_p0), %s1131_s6, 7 }
  0x4c   : > { %s174_s8 = scalar_lea.sflag (!%p1240_p0), [#allocation3], %s1131_s6  ;;  %s1135_s9 = scalar_lea.vmem (!%p1240_p0), [#allocation2], %s600_s7 }
  0x52   : > { %936 = dma.done.wait (%p1241_p5), %s174_s8, 2048  }
  0x53   : > { %938 = vsyncadd (%p1241_p5), %s174_s8, 4294965248  ;;  %p1242_p11 = scmp.eq.s32.totalorder %s1013_s16, 0 }
  0x55   : > { %940 = dma.done.wait (%p1242_p11), [#allocation6], 1024   ;;  %p1243_p1 = pmov %p1242_p11 }
  0x56   : > { %v825_v0 = vld [vmem:[#allocation5] sm:$0xff]   ;;  %v826_v1 = vld [vmem:[#allocation5 + $0x8] sm:$0xff]   ;;  %v827_v2 = vld [vmem:[#allocation5 + $0x10] sm:$0xff]   ;;  %s602_s4 = sshll.u32 %s1131_s6, 6  ;;  %s650_s5 = sshll.u32 %s1013_s16, 10 }
  0x57   : > { %942 = vsyncadd (%p1243_p1), [#allocation6], 4294966272  ;;  %714 = vmatprep.subr.bf16.mxu0 %v825_v0  ;;  %746 = vmatprep.subr.bf16.mxu1 %v825_v0  ;;  %v828_v3 = vld [vmem:[#allocation5 + $0x18] sm:$0xff]   ;;  %v207_v4 = vld [vmem:[%s1135_s9] sm:$0xff]  ;;  %s1165_s25 = scalar_lea.vmem [#allocation7], %s602_s4  ;;  %s1178_s11 = scalar_lea.hbm %s1229_s3, %s650_s5 }
  0x58   : > { %715 = vmatpush3.bf16.msra.mxu0 %v825_v0  ;;  %754 = vmatpush3.bf16.msra.mxu1 %v825_v0  ;;  %v208_v5 = vld [vmem:[%s1135_s9 + $0x8] sm:$0xff]  ;;  %v215_v6 = vld [vmem:[%s1135_s9 + $0x40] sm:$0xff]  ;;  %v831_v12 = vld [vmem:[#allocation5 + $0x30] sm:$0xff]   ;;  %s509_s26 = sshll.u32 %s1165_s25, 4  ;;  %s496_s27 = scalar_lea.sflag [#allocation4], %s1131_s6  ;;  %s1173_s26 = int_to_ptr.vmem [resolvable:$true] %s509_s26 }
  0x59   : > { %716 = vmatprep.subr.bf16.mxu0 %v826_v1  ;;  %747 = vmatprep.subr.bf16.mxu1 %v826_v1  ;;  %v223_v7 = vpack.c.bf16 %v208_v5, %v207_v4  ;;  %v216_v8 = vld [vmem:[%s1135_s9 + $0x48] sm:$0xff]  ;;  %v829_v10 = vld [vmem:[#allocation5 + $0x20] sm:$0xff]   ;;  %v832_v13 = vld [vmem:[#allocation5 + $0x38] sm:$0xff]   ;;  %s891_s28 = scalar_lea.vmem %s1173_s26, 1024  ;;  %s969_s29 = smov [#allocation7]  }
  0x5a   : > { %v227_v9 = vpack.c.bf16 %v216_v8, %v215_v6  ;;  %v830_v11 = vld [vmem:[#allocation5 + $0x28] sm:$0xff]   ;;  %v209_v14 = vld [vmem:[%s1135_s9 + $0x10] sm:$0xff]  ;;  %v210_v15 = vld [vmem:[%s1135_s9 + $0x18] sm:$0xff]  ;;  %p892_p4 = scmp.ne.s32.totalorder %s1173_s26, %s891_s28  ;;  %s895_s23 = sshll.u32 %s969_s29, 4  ;;  %s896_s23 = int_to_ptr.vmem [resolvable:$false] %s895_s23 }
  0x5b   : > { %730 = vmatprep.mubr.bf16.mxu0 %v223_v7  ;;  %v217_v16 = vld [vmem:[%s1135_s9 + $0x50] sm:$0xff]  ;;  %v218_v17 = vld [vmem:[%s1135_s9 + $0x58] sm:$0xff]  ;;  %v211_v18 = vld [vmem:[%s1135_s9 + $0x20] sm:$0xff]  ;;  %v224_v22 = vpack.c.bf16 %v210_v15, %v209_v14  ;;  %s897_s30 = scalar_lea.vmem %s896_s23, 2048  ;;  %p898_p10 = scmp.lt.s32.totalorder %s1173_s26, %s896_s23 }
  0x5c   : > { %717 = vmatpush3.bf16.msra.mxu0 %v826_v1  ;;  %755 = vmatpush3.bf16.msra.mxu1 %v826_v1  ;;  %v212_v19 = vld [vmem:[%s1135_s9 + $0x28] sm:$0xff]  ;;  %v219_v20 = vld [vmem:[%s1135_s9 + $0x60] sm:$0xff]  ;;  %v228_v23 = vpack.c.bf16 %v218_v17, %v217_v16  ;;  %v213_v26 = vld [vmem:[%s1135_s9 + $0x30] sm:$0xff]  ;;  %p893_p6 = pnand %p892_p4, %p1083_p12  ;;  %p899_p13 = scmp.lt.s32.totalorder %s897_s30, %s891_s28 }
  0x5d   : > { %718 = vmatprep.subr.bf16.mxu0 %v827_v2  ;;  %748 = vmatprep.subr.bf16.mxu1 %v827_v2  ;;  %v220_v21 = vld [vmem:[%s1135_s9 + $0x68] sm:$0xff]  ;;  %v225_v24 = vpack.c.bf16 %v212_v19, %v211_v18  ;;  %v214_v27 = vld [vmem:[%s1135_s9 + $0x38] sm:$0xff]  ;;  %v221_v28 = vld [vmem:[%s1135_s9 + $0x70] sm:$0xff] }
  0x5e   : > { %738 = vmatprep.mubr.bf16.mxu1 %v227_v9  ;;  %v229_v25 = vpack.c.bf16 %v220_v21, %v219_v20  ;;  %v222_v29 = vld [vmem:[%s1135_s9 + $0x78] sm:$0xff]  ;;  %v226_v30 = vpack.c.bf16 %v214_v27, %v213_v26  ;;  %v603_v32 = vld [vmem:[%s1228_s2] ss:$0 sm:$0xff]  ;;  %p894_p8 = pneg %p893_p6  ;;  %p900_p3 = por %p899_p13, %p898_p10 }
  0x5f   : > { %v230_v31 = vpack.c.bf16 %v222_v29, %v221_v28 }
  0x60   : > { %719 = vmatpush3.bf16.msra.mxu0 %v827_v2  ;;  %756 = vmatpush3.bf16.msra.mxu1 %v827_v2  ;;  %p901_p7 = pnand %p900_p3, %p894_p8 }
  0x61   : > { %720 = vmatprep.subr.bf16.mxu0 %v828_v3  ;;  %749 = vmatprep.subr.bf16.mxu1 %v828_v3 }
  0x64   : > { %721 = vmatpush3.bf16.msra.mxu0 %v828_v3  ;;  %757 = vmatpush3.bf16.msra.mxu1 %v828_v3 }
  0x65   : > { %722 = vmatprep.subr.bf16.mxu0 %v829_v10  ;;  %750 = vmatprep.subr.bf16.mxu1 %v829_v10 }
  0x68   : > { %723 = vmatpush3.bf16.msra.mxu0 %v829_v10  ;;  %758 = vmatpush3.bf16.msra.mxu1 %v829_v10 }
  0x69   : > { %724 = vmatprep.subr.bf16.mxu0 %v830_v11  ;;  %751 = vmatprep.subr.bf16.mxu1 %v830_v11 }
  0x6c   : > { %725 = vmatpush3.bf16.msra.mxu0 %v830_v11  ;;  %759 = vmatpush3.bf16.msra.mxu1 %v830_v11 }
  0x6d   : > { %726 = vmatprep.subr.bf16.mxu0 %v831_v12  ;;  %752 = vmatprep.subr.bf16.mxu1 %v831_v12 }
  0x70   : > { %727 = vmatpush3.bf16.msra.mxu0 %v831_v12  ;;  %760 = vmatpush3.bf16.msra.mxu1 %v831_v12 }
  0x71   : > { %728 = vmatprep.subr.bf16.mxu0 %v832_v13  ;;  %753 = vmatprep.subr.bf16.mxu1 %v832_v13 }
  0x74   : > { %729 = vmatpush3.bf16.msra.mxu0 %v832_v13  ;;  %761 = vmatpush3.bf16.msra.mxu1 %v832_v13 }
  0x77   : > { %731 = vmatmul.mubr.bf16.vlgmr.msra.gmra.mrb[0].mxu0 %v224_v22  ;;  %739 = vmatmul.mubr.bf16.vlgmr.msra.gmra.mrb[0].mxu1 %v228_v23 }
  0x78   : > { %734 = vmatprep.mubr.bf16.mxu0 %v225_v24  ;;  %742 = vmatprep.mubr.bf16.mxu1 %v229_v25 }
  0x7f   : > { %735 = vmatmul.mubr.bf16.gmra.mrb[4].mxu0 %v226_v30  ;;  %743 = vmatmul.mubr.bf16.gmra.mrb[4].mxu1 %v230_v31 }
 0x14a   : > { %v732_v33 = vpop.f32.mrb[0].mxu0  ;;  %v740_v34 = vpop.f32.mrb[0].mxu1 }
 0x14b   : > { %v345_v35 = vadd.f32 %v732_v33, %v603_v32  ;;  %v377_v36 = vadd.f32 %v740_v34, %v603_v32  ;;  %v336_v37 = vpop.f32.mrb[1].mxu0  ;;  %v368_v38 = vpop.f32.mrb[1].mxu1 }
 0x14c   : > { %v337_v39 = vadd.f32 %v603_v32, %v336_v37  ;;  %v369_v40 = vadd.f32 %v603_v32, %v368_v38  ;;  %v733_v41 = vpop.f32.mrb[2].mxu0  ;;  %v741_v42 = vpop.f32.mrb[2].mxu1 }
 0x14d   : > { %v348_v43 = vadd.f32 %v733_v41, %v603_v32  ;;  %v380_v44 = vadd.f32 %v741_v42, %v603_v32  ;;  %v339_v45 = vpop.f32.mrb[3].mxu0  ;;  %v371_v46 = vpop.f32.mrb[3].mxu1  ;;  %v401_v49 = vmax.f32 %v345_v35, 0.0  ;;  %v409_v50 = vmax.f32 %v377_v36, 0.0 }
 0x14e   : > { %v340_v47 = vadd.f32 %v603_v32, %v339_v45  ;;  %v372_v48 = vadd.f32 %v603_v32, %v371_v46  ;;  %v399_v53 = vmax.f32 %v337_v39, 0.0  ;;  %v407_v54 = vmax.f32 %v369_v40, 0.0 }
 0x14f   : > { %v402_v51 = vmax.f32 %v348_v43, 0.0  ;;  %v410_v52 = vmax.f32 %v380_v44, 0.0 }
 0x150   : > { %v400_v55 = vmax.f32 %v340_v47, 0.0  ;;  %v408_v56 = vmax.f32 %v372_v48, 0.0 }
 0x151   : > { %v659_v57 = vpack.c.bf16 %v402_v51, %v401_v49  ;;  %v679_v58 = vpack.c.bf16 %v410_v52, %v409_v50 }
 0x152   : > { %v654_v59 = vpack.c.bf16 %v400_v55, %v399_v53  ;;  %v674_v60 = vpack.c.bf16 %v408_v56, %v407_v54  ;;  %v736_v61 = vpop.f32.mrb[4].mxu0  ;;  %v744_v62 = vpop.f32.mrb[4].mxu1 }
 0x153   : > { %691 = vst [vmem:[%s1165_s25 + $0x8] sm:$0xff] %v659_v57   ;;  %695 = vst [vmem:[%s1165_s25 + $0x28] sm:$0xff] %v679_v58   ;;  %v361_v63 = vadd.f32 %v736_v61, %v603_v32  ;;  %v393_v0 = vadd.f32 %v744_v62, %v603_v32  ;;  %v352_v1 = vpop.f32.mrb[5].mxu0  ;;  %v384_v2 = vpop.f32.mrb[5].mxu1 }
 0x154   : > { %655 = vst [vmem:[%s1165_s25] sm:$0xff] %v654_v59   ;;  %694 = vst [vmem:[%s1165_s25 + $0x20] sm:$0xff] %v674_v60   ;;  %v353_v3 = vadd.f32 %v603_v32, %v352_v1  ;;  %v385_v4 = vadd.f32 %v603_v32, %v384_v2  ;;  %v737_v5 = vpop.f32.mrb[6].mxu0  ;;  %v745_v6 = vpop.f32.mrb[6].mxu1 }
 0x155   : > { %v364_v7 = vadd.f32 %v737_v5, %v603_v32  ;;  %v396_v8 = vadd.f32 %v745_v6, %v603_v32  ;;  %v355_v9 = vpop.f32.mrb[7].mxu0  ;;  %v387_v10 = vpop.f32.mrb[7].mxu1  ;;  %v405_v13 = vmax.f32 %v361_v63, 0.0  ;;  %v413_v14 = vmax.f32 %v393_v0, 0.0 }
 0x156   : > { %v356_v11 = vadd.f32 %v603_v32, %v355_v9  ;;  %v388_v12 = vadd.f32 %v603_v32, %v387_v10  ;;  %v403_v17 = vmax.f32 %v353_v3, 0.0  ;;  %v411_v18 = vmax.f32 %v385_v4, 0.0 }
 0x157   : > { %v406_v15 = vmax.f32 %v364_v7, 0.0  ;;  %v414_v16 = vmax.f32 %v396_v8, 0.0 }
 0x158   : > { %v404_v19 = vmax.f32 %v356_v11, 0.0  ;;  %v412_v20 = vmax.f32 %v388_v12, 0.0 }
 0x159   : > { %v669_v21 = vpack.c.bf16 %v406_v15, %v405_v13  ;;  %v689_v22 = vpack.c.bf16 %v414_v16, %v413_v14 }
 0x15a   : > { %v664_v23 = vpack.c.bf16 %v404_v19, %v403_v17  ;;  %v684_v24 = vpack.c.bf16 %v412_v20, %v411_v18 }
 0x15b   : > { %693 = vst [vmem:[%s1165_s25 + $0x18] sm:$0xff] %v669_v21   ;;  %697 = vst [vmem:[%s1165_s25 + $0x38] sm:$0xff] %v689_v22  }
 0x15c   : > { %692 = vst [vmem:[%s1165_s25 + $0x10] sm:$0xff] %v664_v23   ;;  %696 = vst [vmem:[%s1165_s25 + $0x30] sm:$0xff] %v684_v24  }
 0x15d   : > { %904 = shalt.err (!%p901_p7)
}
 0x15e   : > { %s905_s22 = scalar_lea.hbm %s1178_s11, 1024  ;;  %s909_s9 = scalar_lea.hbm %s1229_s3, 2048 }
 0x15f   : > { %p906_p9 = scmp.ne.s32.totalorder %s1178_s11, %s905_s22  ;;  %p910_p5 = scmp.lt.u32.totalorder %s1178_s11, %s1229_s3 }
 0x160   : > { %p911_p11 = scmp.lt.u32.totalorder %s909_s9, %s905_s22  ;;  %p913_p4 = scmp.lt.u32.totalorder %s905_s22, %s1178_s11 }
 0x161   : > { %p907_p2 = pnand %p906_p9, %p1083_p12 }
 0x162   : > { %p912_p1 = por %p911_p11, %p910_p5 }
 0x163   : > { %p908_p0 = pneg %p907_p2 }
 0x164   : > { %p914_p6 = por %p913_p4, %p912_p1 }
 0x166   : > { %p915_p8 = pnand %p914_p6, %p908_p0 }
 0x168   : > { %918 = shalt.err (!%p915_p8)
}
 0x169   : > { %s970_s4 = smov 64   ;;  %s971_s25 = smov 4  }
 0x16a   : > { %768 = dma.vmem_to_hbm [thread:$0]  (%p1083_p12), %s1173_s26, 1024, %s1178_s11, %s496_s27, %s970_s4, %s970_s4, %s971_s25  }
 0x16b PF: > { %s524_s5 = sand.u32 1, %s949_s12   ;;  %p1244_p10 = scmp.ne.s32.totalorder %s1234_s19, 0 }
 0x16c   : > { %p1245_p13 = scmp.ge.s32.totalorder %s961_s15, 2  ;;  %s525_s16 = scalar_lea.sflag [#allocation4], %s524_s5 }
 0x16e   : > { %p779_p3 = pnand %p1245_p13, %p1244_p10 }
 0x170   : > { %944 = dma.done.wait (!%p779_p3), %s525_s16, 1024  }
 0x171   : > { %946 = vsyncadd (!%p779_p3), %s525_s16, 4294966272  ;;  %p17_p7 = scmp.ge.s32.totalorder %s1048_s24, 4   ;;  %s1246_s12 = smov %s953_s13 }
 0x172   : > { %s1247_s13 = smov %s957_s14  ;;  %s1248_s14 = smov %s1079_s17 }
 0x173   : > { %s1249_s15 = smov %s1048_s24  ;;  %19 = sbr.rel (!%p17_p7) target bundleno = 6 (0x6), region = 81 }
 0x17a   :  { %530 = vsyncpa [#allocation3], 1 }
 0x17b   :  { %532 = vsyncpa [#allocation3 + $0x1], 1 }
 0x17c   :  { %533 = vsyncpa [#allocation6], 1 }
 0x17d   :  { %534 = vsyncpa [#allocation4], 1 }
 0x17e   :  { %536 = vsyncpa [#allocation4 + $0x1], 1 }

</bundles_post_ra>
